<compile_context>
chip_gen: v5e
topology: v5e:2x2
jax: 0.10.0
libtpu: 0.0.40
codegen_flags: <defaults>
</compile_context>

<pallas_src>
import functools

import jax
import jax.numpy as jnp
from jax import lax
from jax.experimental import pallas as pl


# ----------------------------------------------------------------------------
# Fused multi-head GAT layer kernel (all heads in one call, no grid)
# ----------------------------------------------------------------------------
def _gat_layer_kernel(h_ref, wall_ref, wsrc_ref, wdst_ref, bias_ref, out_ref,
                      *, num_heads, dout, apply_elu):
    h = h_ref[...]                                                  # [N, Din]

    # one wide MXU call projects every head:  z_all[:, hd*Dout:(hd+1)*Dout]
    z_all = jnp.dot(h, wall_ref[...],
                    preferred_element_type=jnp.float32)             # [N, H*Dout]
    # a_src / a_dst folded into the projection: e_src[:, hd] = (h @ W_hd) . a_src_hd
    e_src = jnp.dot(h, wsrc_ref[...],
                    preferred_element_type=jnp.float32)             # [N, H]
    e_dst = jnp.dot(h, wdst_ref[...],
                    preferred_element_type=jnp.float32)             # [N, H]

    bias = bias_ref[...]                                            # [N, N] shared

    outs = []
    for hd in range(num_heads):                  # static unroll, H is tiny
        z = z_all[:, hd * dout:(hd + 1) * dout]                     # [N, Dout]
        e = e_src[:, hd:hd + 1] + e_dst[:, hd:hd + 1].T             # [N, N]
        e = jnp.where(e > 0, e, 0.2 * e)                            # LeakyReLU
        e = e + bias                             # community bias + (-1e9) mask

        # softmax over neighbours
        m = jnp.max(e, axis=-1, keepdims=True)
        p = jnp.exp(e - m)
        denom = jnp.sum(p, axis=-1, keepdims=True)
        alpha = p * pl.reciprocal(denom, approx=True)               # [N, N]

        o = jnp.dot(alpha, z, preferred_element_type=jnp.float32)   # [N, Dout]
        if apply_elu:
            # exp(min(o,0)) avoids inf in the unselected branch
            o = jnp.where(o > 0, o, jnp.exp(jnp.minimum(o, 0.0)) - 1.0)
        outs.append(o)

    out = outs[0] if num_heads == 1 else jnp.concatenate(outs, axis=-1)
    out_ref[...] = out.astype(out_ref.dtype)     # single full-extent store


def gat_layer(h, bias, W, a_src, a_dst, *, apply_elu):
    """Multi-head GAT layer, heads concatenated along the feature axis.

    h:     [N, Din]      node features
    bias:  [N, N]        precomputed community bias + adjacency mask (additive)
    W:     [H, Din, Dout]
    a_src: [H, Dout]
    a_dst: [H, Dout]
    returns [N, H * Dout]
    """
    N, Din = h.shape
    H, _, Dout = W.shape

    # all-head projection matrix  [Din, H*Dout]  (head-major column blocks)
    W_all = jnp.transpose(W, (1, 0, 2)).reshape(Din, H * Dout)
    # fold attention vectors into the projection:  w_src[:, hd] = W[hd] @ a_src[hd]
    w_src = jnp.einsum('hij,hj->ih', W, a_src)                      # [Din, H]
    w_dst = jnp.einsum('hij,hj->ih', W, a_dst)                      # [Din, H]

    kernel = functools.partial(_gat_layer_kernel, num_heads=H, dout=Dout,
                               apply_elu=apply_elu)
    return pl.pallas_call(
        kernel,
        out_shape=jax.ShapeDtypeStruct((N, H * Dout), jnp.float32),
    )(h, W_all, w_src, w_dst, bias)


def attention_bias(v, adj):
    """Precompute the per-graph additive attention bias (shared by all heads/layers)."""
    C = v.shape[-1]
    comm = jnp.dot(v, v.T) * (1.0 / jnp.sqrt(jnp.float32(C)))
    mask = jnp.where(adj > 0, 0.0, -1e9)
    return (comm + mask).astype(jnp.float32)


# ----------------------------------------------------------------------------
# Fused FCM kernel (fuzzifier m = 2): all iterations inside one pallas_call
# ----------------------------------------------------------------------------
def _fcm_kernel(emb_ref, cen_ref, u_ref, *, iters):
    e = emb_ref[...]                                                # [N, D]
    ee = jnp.sum(e * e, axis=-1, keepdims=True)                     # [N, 1]

    def membership(c):                                              # c: [K, D]
        # squared distances via (|e|^2 + |c|^2 - 2 e.c); contract on D without .T
        cross = lax.dot_general(e, c, (((1,), (1,)), ((), ())),
                                preferred_element_type=jnp.float32)  # [N, K]
        d2 = ee + jnp.sum(c * c, axis=-1)[None, :] - 2.0 * cross
        d2 = jnp.maximum(d2, 1e-9)
        inv = pl.reciprocal(d2, approx=True)                        # m=2 -> exponent 1
        return inv * pl.reciprocal(jnp.sum(inv, axis=-1, keepdims=True),
                                   approx=True)

    u0 = membership(cen_ref[...])

    def body(i, u):
        um = u * u                                                  # u ** m, m=2
        num = lax.dot_general(um, e, (((0,), (0,)), ((), ())),
                              preferred_element_type=jnp.float32)   # [K, D]
        den = jnp.maximum(jnp.sum(um, axis=0)[:, None], 1e-9)       # [K, 1]
        c = num * pl.reciprocal(den, approx=True)
        return membership(c)

    u_ref[...] = lax.fori_loop(0, iters, body, u0, unroll=True)


def fcm(emb, K, m=2, iters=10):
    """Fuzzy c-means on node embeddings.  Returns membership matrix [N, K]."""
    assert m == 2, "kernel specialised for fuzzifier m = 2"
    N, D = emb.shape
    centers = emb[:K, :]                      # deterministic init
    kernel = functools.partial(_fcm_kernel, iters=iters)
    return pl.pallas_call(
        kernel,
        out_shape=jax.ShapeDtypeStruct((N, K), jnp.float32),
    )(emb, centers)


# ----------------------------------------------------------------------------
# Model: 3 GAT layers + FCM
# ----------------------------------------------------------------------------
class MyModelPallas:
    def __init__(self, key, n, hidden1_dim, hidden2_dim, out_dim,
                 num_heads, num_community, K):
        self.k = K
        self.num_community = num_community
        ks = jax.random.split(key, 9)

        def init_head_params(kw, ka, kb, H, din, dout):
            scale = 1.0 / jnp.sqrt(jnp.float32(din))
            W = jax.random.normal(kw, (H, din, dout), jnp.float32) * scale
            a_src = jax.random.normal(ka, (H, dout), jnp.float32) * 0.1
            a_dst = jax.random.normal(kb, (H, dout), jnp.float32) * 0.1
            return W, a_src, a_dst

        self.p1 = init_head_params(ks[0], ks[1], ks[2], num_heads, n, hidden1_dim)
        self.p2 = init_head_params(ks[3], ks[4], ks[5], num_heads,
                                   hidden1_dim * num_heads, hidden2_dim)
        self.p3 = init_head_params(ks[6], ks[7], ks[8], 1,
                                   hidden2_dim * num_heads, out_dim)

    def forward(self, h, v, adj):
        bias = attention_bias(v, adj)          # computed once, shared by all layers
        W1, a1s, a1d = self.p1
        W2, a2s, a2d = self.p2
        W3, a3s, a3d = self.p3
        h = gat_layer(h, bias, W1, a1s, a1d, apply_elu=True)    # GAT_1 + ELU
        h = gat_layer(h, bias, W2, a2s, a2d, apply_elu=True)    # GAT_2 + ELU
        self.emb = gat_layer(h, bias, W3, a3s, a3d, apply_elu=False)  # GAT_3
        self.z = fcm(self.emb, self.k, 2)
        return self.emb, self.z

    def getZ(self):
        return self.z

    def get_emb(self):
        return self.emb


if __name__ == "__main__":
    # small, self-consistent shapes
    N = 16              # number of graph nodes
    n = 8               # input feature dim
    hidden1_dim = 16
    hidden2_dim = 16
    out_dim = 8
    num_heads = 2
    num_community = 4
    K = 3

    key = jax.random.PRNGKey(0)
    k_h, k_v, k_params = jax.random.split(key, 3)

    h = jax.random.normal(k_h, (N, n), jnp.float32)
    v = jax.random.normal(k_v, (N, num_community), jnp.float32)

    # deterministic ring graph with self-loops, dense adjacency mask
    idx = jnp.arange(N)
    adj = (jnp.eye(N, dtype=jnp.float32)
           + jnp.eye(N, dtype=jnp.float32)[(idx + 1) % N]
           + jnp.eye(N, dtype=jnp.float32)[(idx - 1) % N])
    adj = jnp.clip(adj, 0.0, 1.0)

    model = MyModelPallas(k_params, n, hidden1_dim, hidden2_dim, out_dim,
                          num_heads, num_community, K)
    emb, z = model.forward(h, v, adj)
    jax.block_until_ready((emb, z))

    assert emb.shape == (N, out_dim)
    assert z.shape == (N, K)
    assert bool(jnp.all(jnp.isfinite(emb))) and bool(jnp.all(jnp.isfinite(z)))
    print("KERNEL_OK")
</pallas_src>

<mosaic_0001>
module attributes {stable_mosaic.version = 11 : i64} {
  func.func @_gat_layer_kernel(%arg0: memref<16x8xf32, #tpu.memory_space<vmem>>, %arg1: memref<8x32xf32, #tpu.memory_space<vmem>>, %arg2: memref<8x2xf32, #tpu.memory_space<vmem>>, %arg3: memref<8x2xf32, #tpu.memory_space<vmem>>, %arg4: memref<16x16xf32, #tpu.memory_space<vmem>>, %arg5: memref<16x32xf32, #tpu.memory_space<vmem>>) attributes {dimension_semantics = [], scalar_prefetch = 0 : i64, scratch_operands = 0 : i64, tpu.core_type = #tpu.core_type<tc>} {
    %c0 = arith.constant 0 : index
    %c0_0 = arith.constant 0 : index
    %0 = vector.load %arg0[%c0, %c0_0] : memref<16x8xf32, #tpu.memory_space<vmem>>, vector<16x8xf32>
    %c0_1 = arith.constant 0 : index
    %c0_2 = arith.constant 0 : index
    %1 = vector.load %arg1[%c0_1, %c0_2] : memref<8x32xf32, #tpu.memory_space<vmem>>, vector<8x32xf32>
    %cst = arith.constant dense<0.000000e+00> : vector<16x32xf32>
    %2 = tpu.matmul %0, %1, %cst {dimension_numbers = #tpu.dot_dimension_numbers<[1], [0], [0], [1], [0, 0, 1, 1], [], []>} : vector<16x8xf32>, vector<8x32xf32>, vector<16x32xf32> -> vector<16x32xf32>
    %c0_3 = arith.constant 0 : index
    %c0_4 = arith.constant 0 : index
    %3 = vector.load %arg2[%c0_3, %c0_4] : memref<8x2xf32, #tpu.memory_space<vmem>>, vector<8x2xf32>
    %cst_5 = arith.constant dense<0.000000e+00> : vector<16x2xf32>
    %4 = tpu.matmul %0, %3, %cst_5 {dimension_numbers = #tpu.dot_dimension_numbers<[1], [0], [0], [1], [0, 0, 1, 1], [], []>} : vector<16x8xf32>, vector<8x2xf32>, vector<16x2xf32> -> vector<16x2xf32>
    %c0_6 = arith.constant 0 : index
    %c0_7 = arith.constant 0 : index
    %5 = vector.load %arg3[%c0_6, %c0_7] : memref<8x2xf32, #tpu.memory_space<vmem>>, vector<8x2xf32>
    %cst_8 = arith.constant dense<0.000000e+00> : vector<16x2xf32>
    %6 = tpu.matmul %0, %5, %cst_8 {dimension_numbers = #tpu.dot_dimension_numbers<[1], [0], [0], [1], [0, 0, 1, 1], [], []>} : vector<16x8xf32>, vector<8x2xf32>, vector<16x2xf32> -> vector<16x2xf32>
    %c0_9 = arith.constant 0 : index
    %c0_10 = arith.constant 0 : index
    %7 = vector.load %arg4[%c0_9, %c0_10] : memref<16x16xf32, #tpu.memory_space<vmem>>, vector<16x16xf32>
    %8 = vector.extract_strided_slice %2 {offsets = [0, 0], sizes = [16, 16], strides = [1, 1]} : vector<16x32xf32> to vector<16x16xf32>
    %9 = vector.extract_strided_slice %4 {offsets = [0, 0], sizes = [16, 1], strides = [1, 1]} : vector<16x2xf32> to vector<16x1xf32>
    %10 = vector.extract_strided_slice %6 {offsets = [0, 0], sizes = [16, 1], strides = [1, 1]} : vector<16x2xf32> to vector<16x1xf32>
    %11 = tpu.transpose %10, [1, 0] : vector<16x1xf32> -> vector<1x16xf32>
    %12 = vector.broadcast %9 : vector<16x1xf32> to vector<16x16xf32>
    %13 = vector.broadcast %11 : vector<1x16xf32> to vector<16x16xf32>
    %14 = arith.addf %12, %13 : vector<16x16xf32>
    %cst_11 = arith.constant 0.000000e+00 : f32
    %15 = vector.broadcast %cst_11 : f32 to vector<16x16xf32>
    %16 = arith.cmpf ogt, %14, %15 : vector<16x16xf32>
    %cst_12 = arith.constant 2.000000e-01 : f32
    %17 = vector.broadcast %cst_12 : f32 to vector<16x16xf32>
    %18 = arith.mulf %17, %14 : vector<16x16xf32>
    %19 = arith.select %16, %14, %18 : vector<16x16xi1>, vector<16x16xf32>
    %20 = arith.addf %19, %7 : vector<16x16xf32>
    %cst_13 = arith.constant dense<0xFF800000> : vector<16xf32>
    %21 = vector.multi_reduction <maximumf>, %20, %cst_13 [1] : vector<16x16xf32> to vector<16xf32>
    %22 = vector.shape_cast %21 : vector<16xf32> to vector<16x1xf32>
    %23 = vector.broadcast %22 : vector<16x1xf32> to vector<16x16xf32>
    %24 = arith.subf %20, %23 : vector<16x16xf32>
    %25 = math.exp %24 : vector<16x16xf32>
    %cst_14 = arith.constant dense<0.000000e+00> : vector<16xf32>
    %26 = vector.multi_reduction <add>, %25, %cst_14 [1] : vector<16x16xf32> to vector<16xf32>
    %27 = vector.shape_cast %26 : vector<16xf32> to vector<16x1xf32>
    %28 = tpu.reciprocal %27 {approx = true} : vector<16x1xf32> -> vector<16x1xf32>
    %29 = vector.broadcast %28 : vector<16x1xf32> to vector<16x16xf32>
    %30 = arith.mulf %25, %29 : vector<16x16xf32>
    %cst_15 = arith.constant dense<0.000000e+00> : vector<16x16xf32>
    %31 = tpu.matmul %30, %8, %cst_15 {dimension_numbers = #tpu.dot_dimension_numbers<[1], [0], [0], [1], [0, 0, 1, 1], [], []>} : vector<16x16xf32>, vector<16x16xf32>, vector<16x16xf32> -> vector<16x16xf32>
    %cst_16 = arith.constant 0.000000e+00 : f32
    %32 = vector.broadcast %cst_16 : f32 to vector<16x16xf32>
    %33 = arith.cmpf ogt, %31, %32 : vector<16x16xf32>
    %cst_17 = arith.constant 0.000000e+00 : f32
    %34 = vector.broadcast %cst_17 : f32 to vector<16x16xf32>
    %35 = arith.minimumf %31, %34 : vector<16x16xf32>
    %36 = math.exp %35 : vector<16x16xf32>
    %cst_18 = arith.constant 1.000000e+00 : f32
    %37 = vector.broadcast %cst_18 : f32 to vector<16x16xf32>
    %38 = arith.subf %36, %37 : vector<16x16xf32>
    %39 = arith.select %33, %31, %38 : vector<16x16xi1>, vector<16x16xf32>
    %40 = vector.extract_strided_slice %2 {offsets = [0, 16], sizes = [16, 16], strides = [1, 1]} : vector<16x32xf32> to vector<16x16xf32>
    %41 = vector.extract_strided_slice %4 {offsets = [0, 1], sizes = [16, 1], strides = [1, 1]} : vector<16x2xf32> to vector<16x1xf32>
    %42 = vector.extract_strided_slice %6 {offsets = [0, 1], sizes = [16, 1], strides = [1, 1]} : vector<16x2xf32> to vector<16x1xf32>
    %43 = tpu.transpose %42, [1, 0] : vector<16x1xf32> -> vector<1x16xf32>
    %44 = vector.broadcast %41 : vector<16x1xf32> to vector<16x16xf32>
    %45 = vector.broadcast %43 : vector<1x16xf32> to vector<16x16xf32>
    %46 = arith.addf %44, %45 : vector<16x16xf32>
    %cst_19 = arith.constant 0.000000e+00 : f32
    %47 = vector.broadcast %cst_19 : f32 to vector<16x16xf32>
    %48 = arith.cmpf ogt, %46, %47 : vector<16x16xf32>
    %cst_20 = arith.constant 2.000000e-01 : f32
    %49 = vector.broadcast %cst_20 : f32 to vector<16x16xf32>
    %50 = arith.mulf %49, %46 : vector<16x16xf32>
    %51 = arith.select %48, %46, %50 : vector<16x16xi1>, vector<16x16xf32>
    %52 = arith.addf %51, %7 : vector<16x16xf32>
    %cst_21 = arith.constant dense<0xFF800000> : vector<16xf32>
    %53 = vector.multi_reduction <maximumf>, %52, %cst_21 [1] : vector<16x16xf32> to vector<16xf32>
    %54 = vector.shape_cast %53 : vector<16xf32> to vector<16x1xf32>
    %55 = vector.broadcast %54 : vector<16x1xf32> to vector<16x16xf32>
    %56 = arith.subf %52, %55 : vector<16x16xf32>
    %57 = math.exp %56 : vector<16x16xf32>
    %cst_22 = arith.constant dense<0.000000e+00> : vector<16xf32>
    %58 = vector.multi_reduction <add>, %57, %cst_22 [1] : vector<16x16xf32> to vector<16xf32>
    %59 = vector.shape_cast %58 : vector<16xf32> to vector<16x1xf32>
    %60 = tpu.reciprocal %59 {approx = true} : vector<16x1xf32> -> vector<16x1xf32>
    %61 = vector.broadcast %60 : vector<16x1xf32> to vector<16x16xf32>
    %62 = arith.mulf %57, %61 : vector<16x16xf32>
    %cst_23 = arith.constant dense<0.000000e+00> : vector<16x16xf32>
    %63 = tpu.matmul %62, %40, %cst_23 {dimension_numbers = #tpu.dot_dimension_numbers<[1], [0], [0], [1], [0, 0, 1, 1], [], []>} : vector<16x16xf32>, vector<16x16xf32>, vector<16x16xf32> -> vector<16x16xf32>
    %cst_24 = arith.constant 0.000000e+00 : f32
    %64 = vector.broadcast %cst_24 : f32 to vector<16x16xf32>
    %65 = arith.cmpf ogt, %63, %64 : vector<16x16xf32>
    %cst_25 = arith.constant 0.000000e+00 : f32
    %66 = vector.broadcast %cst_25 : f32 to vector<16x16xf32>
    %67 = arith.minimumf %63, %66 : vector<16x16xf32>
    %68 = math.exp %67 : vector<16x16xf32>
    %cst_26 = arith.constant 1.000000e+00 : f32
    %69 = vector.broadcast %cst_26 : f32 to vector<16x16xf32>
    %70 = arith.subf %68, %69 : vector<16x16xf32>
    %71 = arith.select %65, %63, %70 : vector<16x16xi1>, vector<16x16xf32>
    %72 = tpu.concatenate %39, %71 in 1 : vector<16x16xf32>, vector<16x16xf32> -> vector<16x32xf32>
    %c0_27 = arith.constant 0 : index
    %c0_28 = arith.constant 0 : index
    %73 = vector.load %arg5[%c0_27, %c0_28] : memref<16x32xf32, #tpu.memory_space<vmem>>, vector<16x32xf32>
    tpu.vector_store %arg5[%c0_27, %c0_28], %72 {strides = array<i32>} : memref<16x32xf32, #tpu.memory_space<vmem>>, vector<16x32xf32>,
    return
  }
}

</mosaic_0001>

<bundles_post_ra>
// kernel: tpu_custom_call.1
= control target key start
LH: loop header
LB: loop body
LE: loop exit
PB: predicated region body
PF: predicated region fallthrough
CT: control target
= control target key end

     0   :  { %vm24_vm0 = vcmask 64512   ;;  %s547_s0 = inlined_call_operand.vmem [shape: f32[16,8], index: 0, kind: input, shape index: {}]   ;;  %s548_s1 = inlined_call_operand.vmem [shape: f32[8,32], index: 1, kind: input, shape index: {}]   ;;  %s549_s2 = inlined_call_operand.vmem [shape: f32[8,2], index: 2, kind: input, shape index: {}]   ;;  %s550_s3 = inlined_call_operand.vmem [shape: f32[8,2], index: 3, kind: input, shape index: {}]   ;;  %s551_s4 = inlined_call_operand.vmem [shape: f32[16,16], index: 4, kind: input, shape index: {}]   ;;  %s552_s5 = inlined_call_operand.hbm [shape: f32[16,32], index: 5, kind: output, shape index: {}]  }
   0x1   :  { %v23_v0 = vld [vmem:[%s548_s1] sm:$0xff]  ;;  %v22_v2 = vld [vmem:[%s547_s0 + $0x8] sm:$0xff] }
   0x2   :  { %v78_v1 = vld [vmem:[%s550_s3] sm:$0xff]  ;;  %396 = vmatpush.msra.mxu1 %v23_v0 }
   0x3   :  { %94 = vmatpush.msra.mxu2 %v78_v1  ;;  %v21_v3 = vld [vmem:[%s547_s0] sm:$0xff] }
   0x4   :  { %v54_v4 = vld [vmem:[%s549_s2] sm:$0xff] }
   0x5   :  { %10 = vsyncpa [#allocation3], 0  ;;  %383 = vmatmul.msk.f32.vlgmr.msra.gmra.mxu1 %vm24_vm0, %v22_v2  ;;  %386 = vmatmul.msk.f32.vlgmr.msra.gmra.mxu2 %vm24_vm0, %v21_v3  ;;  %v465_v5 = vmov 1   ;;  %v466_v6 = vmov 0   ;;  %s467_s0 = smov 127   ;;  %v102_v24 = vld [vmem:[%s551_s4] sm:$0xff] }
   0x6   :  { %70 = vmatpush.msrb.mxu1 %v54_v4  ;;  %46 = vmatpush.msra.mxu0 %v23_v0  ;;  %vm157_vm2 = vcmask 130048   ;;  %v103_v29 = vld [vmem:[%s551_s4 + $0x8] sm:$0xff]  ;;  %s468_s4 = smov 112   ;;  %s469_s29 = smov 16   ;;  %vm361_vm9 = vcmask 261120  }
   0x7   :  { %382 = vmatmul.msk.f32.vlgmr.msra.gmra.mxu0 %vm24_vm0, %v21_v3  ;;  %406 = vset.pattern.permute.xlu1 %v465_v5  ;;  %s470_s30 = smov [#allocation2]   ;;  %s370_s9 = sshll.u32 %s552_s5, 4  ;;  %s371_s9 = int_to_ptr.hbm [resolvable:$true] %s370_s9 }
   0x8   :  { %407 = vset.pattern.permute.xlu0 %v466_v6  ;;  %s368_s6 = sshll.u32 %s470_s30, 4  ;;  %s471_s10 = smov 128   ;;  %s369_s6 = int_to_ptr.vmem [resolvable:$true] %s368_s6 }
   0x9   :  { %s472_s11 = smov 8  }
   0xd   :  { %384 = vmatmul.msk.f32.vlgmr.msrb.gmra.mxu1 %vm24_vm0, %v21_v3  ;;  %387 = vmatmul.msk.f32.gmra.mxu2 %vm24_vm0, %v22_v2 }
  0x15   :  { %385 = vmatmul.msk.f32.gmra.mxu1 %vm24_vm0, %v22_v2 }
  0x82   :  { %v518_v7 = vpop.f32.mrf.mxu1 }
  0x83   :  { %200 = vmatpush.msra.mxu3 %v518_v7 }
  0x84   :  { %v48_v8 = vpop.f32.mrf.mxu0 }
  0x85   :  { %201 = vmatpush.msra.mxu3 %v48_v8  ;;  %v409_v45 = vpack.i.bf16 %v48_v8, %v518_v7 }
  0x88   :  { %v96_v9 = vpop.f32.mrf.mxu2 }
  0x89   :  { %223 = vrot.lane.b32.xlu0 %v96_v9, %s467_s0 }
  0x8a   :  { %v72_v10 = vpop.f32.mrf.mxu1 }
  0x8b   :  { %262 = vperm.xlu1 %406, %v72_v10  }
  0x90   :  { %v99_v11 = vpop.f32.mrf.mxu2 }
  0x91   :  { %225 = vrot.lane.b32.xlu0 %v99_v11, %s467_s0 }
  0x92   :  { %v75_v12 = vpop.f32.mrf.mxu1 }
  0x93   :  { %266 = vperm.xlu1 %406, %v75_v12  }
  0x99   :  { %138 = vperm.xlu0 %407, %v72_v10  }
  0x9b   :  { %408 = vset.pattern.permute.xlu1 %v466_v6 }
  0x9c   :  { %143 = vperm.xlu1 %408, %v75_v12  }
  0xa1   :  { %414 = vset.pattern.permute.xlu0 %v465_v5 }
  0xd1   :  { %104 = vxpose.xlu1.b32.start [1/2] (short) (narrow) %v96_v9, 8 }
  0xd9   :  { %105 = vxpose.xlu1.b32.end [2/2] (short) (narrow) %v99_v11, 8 }
  0xfb   :  { %v224_v13 = vpop.permute.xlu0 %223 }
  0xfc   :  { %229 = vxpose.xlu2.b32.start [1/2] (short) (narrow) %v224_v13, 8 }
  0xfd   :  { %v263_v15 = vpop.permute.xlu1 %262 }
 0x103   :  { %v226_v14 = vpop.permute.xlu0 %225 }
 0x104   :  { %230 = vxpose.xlu2.b32.end [2/2] (short) (narrow) %v226_v14, 8 }
 0x105   :  { %v267_v16 = vpop.permute.xlu1 %266 }
 0x10b   :  { %v139_v20 = vpop.permute.xlu0 %138 }
 0x10e   :  { %v144_v17 = vpop.permute.xlu1 %143 }
 0x175   :  { %v120_v18 = vpop.trf.xlu1 }
 0x176   :  { %v146_v19 = vperm.slane %v120_v18, 0 }
 0x178   :  { %v147_v21 = vadd.f32 %v146_v19, %v139_v20  ;;  %v148_v22 = vadd.f32 %v146_v19, %v144_v17 }
 0x17a   :  { %v151_v23 = vmul.f32 0.2, %v147_v21  ;;  %vm149_vm1 = vcmp.gt.f32.partialorder %v147_v21, 0.0  ;;  %v152_v25 = vmul.f32 0.2, %v148_v22  ;;  %vm150_vm3 = vcmp.gt.f32.partialorder %v148_v22, 0.0 }
 0x17c   :  { %v153_v26 = vsel %vm149_vm1, %v147_v21, %v151_v23  ;;  %v154_v30 = vsel %vm150_vm3, %v148_v22, %v152_v25 }
 0x17d   :  { %v155_v27 = vadd.f32 %v153_v26, %v102_v24  ;;  %v156_v31 = vadd.f32 %v154_v30, %v103_v29 }
 0x17f   :  { %v158_v28 = vsel %vm157_vm2, %v155_v27, -inf  ;;  %v161_v32 = vsel %vm157_vm2, %v156_v31, -inf }
 0x180   :  { %159 = vmax.xlane.f32.xlu0 %v158_v28 }
 0x188   :  { %162 = vmax.xlane.f32.xlu0 %v161_v32 }
 0x195   :  { %v245_v33 = vpop.trf.xlu2 }
 0x196   :  { %v269_v34 = vperm.slane %v245_v33, 0 }
 0x198   :  { %v270_v35 = vadd.f32 %v269_v34, %v263_v15  ;;  %v271_v36 = vadd.f32 %v269_v34, %v267_v16 }
 0x19a   :  { %v274_v37 = vmul.f32 0.2, %v270_v35  ;;  %v275_v38 = vmul.f32 0.2, %v271_v36  ;;  %vm272_vm4 = vcmp.gt.f32.partialorder %v270_v35, 0.0  ;;  %vm273_vm5 = vcmp.gt.f32.partialorder %v271_v36, 0.0 }
 0x19c   :  { %v276_v39 = vsel %vm272_vm4, %v270_v35, %v274_v37  ;;  %v277_v40 = vsel %vm273_vm5, %v271_v36, %v275_v38 }
 0x19d   :  { %v278_v41 = vadd.f32 %v276_v39, %v102_v24  ;;  %v279_v42 = vadd.f32 %v277_v40, %v103_v29 }
 0x19f   :  { %v280_v43 = vsel %vm157_vm2, %v278_v41, -inf  ;;  %v283_v44 = vsel %vm157_vm2, %v279_v42, -inf }
 0x1a0   :  { %281 = vmax.xlane.f32.xlu2 %v280_v43  ;;  %284 = vmax.xlane.f32.xlu0 %v283_v44 }
 0x1b4   :  { %410 = vrot.lane.b32.xlu0 %v409_v45, %s468_s4 }
 0x1f3   :  { %v160_v46 = vpop.xlane.xlu0 %159 }
 0x1f4   :  { %v164_v47 = vsub.f32 %v155_v27, %v160_v46 }
 0x1f6   :  { %v166_v48 = vmul.f32 1.442695, %v164_v47 }
 0x1f8   :  { %415 = vpow2.f32 %v166_v48 }
 0x1fb   :  { %v163_v49 = vpop.xlane.xlu0 %162 }
 0x1fc   :  { %v165_v50 = vsub.f32 %v156_v31, %v163_v49 }
 0x1fe   :  { %v416_v51 = vpop.eup %415  ;;  %v168_v52 = vmul.f32 1.442695, %v165_v50 }
 0x1ff   :  { %v170_v53 = vsel %vm157_vm2, %v416_v51, 0.0 }
 0x200   :  { %417 = vpow2.f32 %v168_v52  ;;  %171 = vadd.xlane.f32.xlu2 %v170_v53 }
 0x206   :  { %v418_v54 = vpop.eup %417 }
 0x207   :  { %v173_v55 = vsel %vm157_vm2, %v418_v54, 0.0 }
 0x208   :  { %174 = vadd.xlane.f32.xlu2 %v173_v55 }
 0x213   :  { %v282_v56 = vpop.xlane.xlu2 %281  ;;  %v285_v57 = vpop.xlane.xlu0 %284 }
 0x214   :  { %v286_v58 = vsub.f32 %v278_v41, %v282_v56  ;;  %v287_v59 = vsub.f32 %v279_v42, %v285_v57 }
 0x216   :  { %v288_v60 = vmul.f32 1.442695, %v286_v58  ;;  %v290_v61 = vmul.f32 1.442695, %v287_v59 }
 0x218   :  { %419 = vpow2.f32 %v288_v60 }
 0x219   :  { %421 = vpow2.f32 %v290_v61 }
 0x21e   :  { %v420_v62 = vpop.eup %419 }
 0x21f   :  { %v422_v63 = vpop.eup %421  ;;  %v292_v0 = vsel %vm157_vm2, %v420_v62, 0.0 }
 0x220   :  { %293 = vadd.xlane.f32.xlu1 %v292_v0  ;;  %v295_v1 = vsel %vm157_vm2, %v422_v63, 0.0 }
 0x221   :  { %296 = vadd.xlane.f32.xlu0 %v295_v1 }
 0x226   :  { %v411_v2 = vpop.permute.xlu0 %410 }
 0x227   :  { %v412_v3 = vunpack.i.l.bf16 %v411_v2  ;;  %v413_v4 = vunpack.i.h.bf16 %v411_v2 }
 0x229   :  { %330 = vmatpush.msrb.mxu0 %v412_v3 }
 0x22b   :  { %331 = vmatpush.msrb.mxu0 %v413_v4 }
 0x273   :  { %v172_v5 = vpop.xlane.xlu2 %171 }
 0x274   :  { %423 = vrcp.f32 %v172_v5 }
 0x27a   :  { %v424_v6 = vpop.eup %423 }
 0x27b   :  { %v175_v7 = vpop.xlane.xlu2 %174  ;;  %v178_v8 = vmul.f32 %v424_v6, %v416_v51 }
 0x27c   :  { %425 = vrcp.f32 %v175_v7 }
 0x27d   :  { %388 = vmatmul.msk.f32.vlgmr.msra.gmra.mxu3 %vm157_vm2, %v178_v8 }
 0x282   :  { %v426_v9 = vpop.eup %425 }
 0x283   :  { %v179_v10 = vmul.f32 %v426_v9, %v418_v54 }
 0x285   :  { %389 = vmatmul.msk.f32.gmra.mxu3 %vm157_vm2, %v179_v10 }
 0x293   :  { %v294_v11 = vpop.xlane.xlu1 %293 }
 0x294   :  { %427 = vrcp.f32 %v294_v11  ;;  %v297_v12 = vpop.xlane.xlu0 %296 }
 0x295   :  { %429 = vrcp.f32 %v297_v12 }
 0x29a   :  { %v428_v13 = vpop.eup %427 }
 0x29b   :  { %v300_v14 = vmul.f32 %v428_v13, %v420_v62  ;;  %v430_v15 = vpop.eup %429 }
 0x29c   :  { %v301_v16 = vmul.f32 %v430_v15, %v422_v63 }
 0x29d   :  { %392 = vmatmul.msk.f32.vlgmr.msrb.gmra.mxu0 %vm157_vm2, %v300_v14 }
 0x2a5   :  { %393 = vmatmul.msk.f32.gmra.mxu0 %vm157_vm2, %v301_v16 }
 0x300   :  { %v203_v29 = vpop.f32.mrf.mxu3 }
 0x301   :  { %v211_v30 = vmin.f32 %v203_v29, 0.0  ;;  %vm209_vm8 = vcmp.gt.f32.partialorder %v203_v29, 0.0 }
 0x303   :  { %v213_v31 = vmul.f32 1.442695, %v211_v30 }
 0x308   :  { %v206_v37 = vpop.f32.mrf.mxu3 }
 0x309   :  { %v212_v38 = vmin.f32 %v206_v37, 0.0  ;;  %vm210_vm10 = vcmp.gt.f32.partialorder %v206_v37, 0.0 }
 0x30b   :  { %v215_v39 = vmul.f32 1.442695, %v212_v38 }
 0x31a   :  { %v333_v17 = vpop.f32.mrf.mxu0 }
 0x31b   :  { %v341_v18 = vmin.f32 %v333_v17, 0.0  ;;  %vm339_vm6 = vcmp.gt.f32.partialorder %v333_v17, 0.0 }
 0x31d   :  { %v343_v19 = vmul.f32 1.442695, %v341_v18 }
 0x31f   :  { %431 = vpow2.f32 %v343_v19 }
 0x322   :  { %v336_v20 = vpop.f32.mrf.mxu0 }
 0x323   :  { %v342_v21 = vmin.f32 %v336_v20, 0.0  ;;  %vm340_vm7 = vcmp.gt.f32.partialorder %v336_v20, 0.0 }
 0x325   :  { %v432_v22 = vpop.eup %431  ;;  %v345_v23 = vmul.f32 1.442695, %v342_v21 }
 0x326   :  { %v394_v24 = vadd.f32 -1.0, %v432_v22 }
 0x327   :  { %433 = vpow2.f32 %v345_v23 }
 0x328   :  { %v349_v25 = vsel %vm339_vm6, %v333_v17, %v394_v24  ;;  %435 = vpow2.f32 %v213_v31 }
 0x329   :  { %353 = vrot.lane.b32.xlu2 %v349_v25, %s469_s29  ;;  %437 = vpow2.f32 %v215_v39 }
 0x32d   :  { %v434_v26 = vpop.eup %433 }
 0x32e   :  { %v395_v27 = vadd.f32 -1.0, %v434_v26  ;;  %v436_v32 = vpop.eup %435 }
 0x32f   :  { %v390_v33 = vadd.f32 -1.0, %v436_v32  ;;  %v438_v40 = vpop.eup %437 }
 0x330   :  { %v350_v28 = vsel %vm340_vm7, %v336_v20, %v395_v27  ;;  %v391_v41 = vadd.f32 -1.0, %v438_v40 }
 0x331   :  { %355 = vrot.lane.b32.xlu0 %v350_v28, %s469_s29  ;;  %v219_v34 = vsel %vm209_vm8, %v203_v29, %v390_v33 }
 0x332   :  { %v220_v42 = vsel %vm210_vm10, %v206_v37, %v391_v41 }
 0x383   :  { %v354_v35 = vpop.permute.xlu2 %353 }
 0x384   :  { %v359_v36 = vsel %vm157_vm2, %v219_v34, %v354_v35 }
 0x385   :  { %362 = vst.msk [vmem:[#allocation2] sm:$0xff] %vm361_vm9, %v359_v36 }
 0x3a3   :  { %v356_v43 = vpop.permute.xlu0 %355 }
 0x3a4   :  { %v360_v44 = vsel %vm157_vm2, %v220_v42, %v356_v43 }
 0x3a5   :  { %363 = vst.msk [vmem:[#allocation2 + $0x8] sm:$0xff] %vm361_vm9, %v360_v44 }
 0x3a6   :  { %376 = dma.vmem_to_hbm [thread:$0]  %s369_s6, 256, %s371_s9, [#allocation3], %s471_s10, %s471_s10, %s472_s11  }
 0x3a7   :  { %463 = dma.done.wait [#allocation3], 256  }
 0x3a8   :  { %464 = vsyncadd [#allocation3], 4294967040 }
 0x3a9   :  { %381 = vsyncpa [#allocation3], 1 }

</bundles_post_ra>
